<compile_context>
chip_gen: v5e
topology: v5e:2x2
jax: 0.10.0
libtpu: 0.0.40
codegen_flags: <defaults>
</compile_context>

<pallas_src>
import math

import numpy as np
import jax
import jax.numpy as jnp
from jax.experimental import pallas as pl
from jax.experimental.pallas import tpu as pltpu


def _denormalize_kernel(x_ref, std_ref, mean_ref, o_ref):
    # Elementwise hot path: out = x * std + mean.
    # std/mean are (1, W) rows, broadcast over the sublane (row) axis for free.
    o_ref[...] = x_ref[...] * std_ref[...] + mean_ref[...]


def _round_up(x: int, m: int) -> int:
    return ((x + m - 1) // m) * m


def _choose_fold(B: int, C: int) -> int:
    """Smallest k with (k*C) % 128 == 0 and B % k == 0 (lane-dense rows)."""
    if C % 128 == 0:
        return 1
    k = 128 // math.gcd(C, 128)
    if B % k != 0:
        return 1  # cannot fold cleanly; fall back to full-width (B, C) blocks
    return k


def denormalize(x: jax.Array, mean, std, *, inplace: bool = False,
                target_tile_bytes: int = 2 << 20) -> jax.Array:
    """Pallas equivalent of Denormalize.forward for a (B, C) float tensor."""
    if x.ndim != 2:
        raise ValueError(
            "Expected tensor to be a tensor of size (B, C). Got shape = {}.".format(x.shape))
    if not jnp.issubdtype(x.dtype, jnp.floating):
        raise TypeError("Input tensor should be a float tensor. Got {}.".format(x.dtype))

    dtype = x.dtype
    itemsize = jnp.dtype(dtype).itemsize

    # Host-side std==0 validation only (no device sync, no jit break). This is
    # the common case for module parameters passed as python lists / numpy.
    if not isinstance(std, jax.Array):
        std_host = np.asarray(std).astype(np.dtype(dtype))
        if np.any(std_host == 0):
            raise ValueError(
                "std evaluated to zero after conversion to {}, leading to division "
                "by zero.".format(dtype))

    mean = jnp.asarray(mean, dtype=dtype).reshape(1, -1)
    std = jnp.asarray(std, dtype=dtype).reshape(1, -1)

    B, C = x.shape

    # ---- Lane-dense folding: (B, C) -> (B//k, k*C) with k*C % 128 == 0 ------
    k = _choose_fold(B, C)
    Bf, W = B // k, k * C
    if k > 1:
        x_w = x.reshape(Bf, W)
        std_w = jnp.tile(std, (1, k))
        mean_w = jnp.tile(mean, (1, k))
    else:
        x_w, std_w, mean_w = x, std, mean

    # ---- Batch tile selection ------------------------------------------------
    sub = max(8, 32 // itemsize)  # sublane packing: 8 (f32), 16 (bf16/f16)
    if Bf <= sub:
        bb = Bf  # full-extent block (allowed even when < 8 rows)
    else:
        # Target ~target_tile_bytes per x tile (in + out, double-buffered, is
        # ~4x that -> ~8 MiB, safe on every generation incl. v7x's 64 MiB VMEM).
        bb = max(sub, (target_tile_bytes // max(1, W * itemsize)) // sub * sub)
        if bb >= Bf:
            # Keep >= 2 grid steps on the 'parallel' axis so both v7x TCs work.
            bb = min(_round_up(pl.cdiv(Bf, 2), sub), Bf)

    grid = (pl.cdiv(Bf, bb),)

    cost = pl.CostEstimate(
        flops=2 * B * C,
        transcendentals=0,
        bytes_accessed=int((2 * B * C + 2 * W) * itemsize),
    )

    out_w = pl.pallas_call(
        _denormalize_kernel,
        out_shape=jax.ShapeDtypeStruct((Bf, W), dtype),
        grid_spec=pltpu.PrefetchScalarGridSpec(
            num_scalar_prefetch=0,
            grid=grid,
            in_specs=[
                pl.BlockSpec((bb, W), lambda i: (i, 0)),   # x tile over batch
                pl.BlockSpec((1, W), lambda i: (0, 0)),    # std row, resident
                pl.BlockSpec((1, W), lambda i: (0, 0)),    # mean row, resident
            ],
            out_specs=pl.BlockSpec((bb, W), lambda i: (i, 0)),
        ),
        compiler_params=pltpu.CompilerParams(
            dimension_semantics=("parallel",),
            vmem_limit_bytes=40 << 20,
        ),
        cost_estimate=cost,
        input_output_aliases={0: 0} if inplace else {},
    )(x_w, std_w, mean_w)

    return out_w.reshape(B, C) if k > 1 else out_w


if __name__ == "__main__":
    key = jax.random.PRNGKey(0)
    kx, km, ks = jax.random.split(key, 3)

    B, C = 8, 32  # small (B, C) tensor consistent with the module's 2-D contract
    x = jax.random.normal(kx, (B, C), dtype=jnp.float32)
    # Deterministic "parameters": per-channel mean / std (std strictly positive),
    # provided as host numpy arrays like typical module constructor args.
    mean = np.asarray(jax.random.normal(km, (C,), dtype=jnp.float32))
    std = np.asarray(jax.random.uniform(ks, (C,), dtype=jnp.float32, minval=0.5, maxval=2.0))

    out = denormalize(x, mean, std)
    out = jax.block_until_ready(out)

    # Reference check in plain JAX.
    ref = x * jnp.asarray(std).reshape(1, -1) + jnp.asarray(mean).reshape(1, -1)
    assert out.shape == (B, C) and out.dtype == x.dtype
    assert jnp.allclose(out, ref, atol=1e-6, rtol=1e-6)

    # Also exercise a larger, lane-dense-foldable shape to cover the tiling path.
    B2, C2 = 4096, 24  # 24*16 = 384 lanes (multiple of 128), 4096 % 16 == 0
    x2 = jax.random.normal(kx, (B2, C2), dtype=jnp.float32)
    mean2 = np.linspace(-1.0, 1.0, C2, dtype=np.float32)
    std2 = np.linspace(0.5, 2.0, C2, dtype=np.float32)
    out2 = jax.block_until_ready(denormalize(x2, mean2, std2))
    ref2 = x2 * jnp.asarray(std2).reshape(1, -1) + jnp.asarray(mean2).reshape(1, -1)
    assert jnp.allclose(out2, ref2, atol=1e-5, rtol=1e-5)

    print("KERNEL_OK")
</pallas_src>

<mosaic_0001>
module attributes {stable_mosaic.version = 11 : i64} {
  func.func @_denormalize_kernel(%arg0: i32, %arg1: memref<2x128xf32, #tpu.memory_space<vmem>>, %arg2: memref<1x128xf32, #tpu.memory_space<vmem>>, %arg3: memref<1x128xf32, #tpu.memory_space<vmem>>, %arg4: memref<2x128xf32, #tpu.memory_space<vmem>>) attributes {dimension_semantics = [#tpu.dimension_semantics<parallel>], iteration_bounds = array<i64: 1>, scalar_prefetch = 0 : i64, scratch_operands = 0 : i64, tpu.core_type = #tpu.core_type<tc>, window_params = [{transform_indices = @transform_0, window_bounds = array<i64: 2, 128>}, {pipeline_mode = #tpu.pipeline_mode<synchronous>, transform_indices = @transform_1, window_bounds = array<i64: 1, 128>}, {pipeline_mode = #tpu.pipeline_mode<synchronous>, transform_indices = @transform_2, window_bounds = array<i64: 1, 128>}, {transform_indices = @transform_3, window_bounds = array<i64: 2, 128>}]} {
    %c0 = arith.constant 0 : index
    %c0_0 = arith.constant 0 : index
    %0 = vector.load %arg1[%c0, %c0_0] : memref<2x128xf32, #tpu.memory_space<vmem>>, vector<2x128xf32>
    %c0_1 = arith.constant 0 : index
    %c0_2 = arith.constant 0 : index
    %1 = vector.load %arg2[%c0_1, %c0_2] : memref<1x128xf32, #tpu.memory_space<vmem>>, vector<1x128xf32>
    %2 = vector.broadcast %1 : vector<1x128xf32> to vector<2x128xf32>
    %3 = arith.mulf %0, %2 : vector<2x128xf32>
    %c0_3 = arith.constant 0 : index
    %c0_4 = arith.constant 0 : index
    %4 = vector.load %arg3[%c0_3, %c0_4] : memref<1x128xf32, #tpu.memory_space<vmem>>, vector<1x128xf32>
    %5 = vector.broadcast %4 : vector<1x128xf32> to vector<2x128xf32>
    %6 = arith.addf %3, %5 : vector<2x128xf32>
    %c0_5 = arith.constant 0 : index
    %c0_6 = arith.constant 0 : index
    %7 = vector.load %arg4[%c0_5, %c0_6] : memref<2x128xf32, #tpu.memory_space<vmem>>, vector<2x128xf32>
    tpu.vector_store %arg4[%c0_5, %c0_6], %6 {strides = array<i32>} : memref<2x128xf32, #tpu.memory_space<vmem>>, vector<2x128xf32>,
    return
  }
  func.func @transform_0(%arg0: i32) -> (i32, i32) {
    %c0_i32 = arith.constant 0 : i32
    %c0_i32_0 = arith.constant 0 : i32
    return %arg0, %c0_i32 : i32, i32
  }
  func.func @transform_1(%arg0: i32) -> (i32, i32) {
    %c0_i32 = arith.constant 0 : i32
    %c0_i32_0 = arith.constant 0 : i32
    %c0_i32_1 = arith.constant 0 : i32
    return %c0_i32, %c0_i32_0 : i32, i32
  }
  func.func @transform_2(%arg0: i32) -> (i32, i32) {
    %c0_i32 = arith.constant 0 : i32
    %c0_i32_0 = arith.constant 0 : i32
    %c0_i32_1 = arith.constant 0 : i32
    return %c0_i32, %c0_i32_0 : i32, i32
  }
  func.func @transform_3(%arg0: i32) -> (i32, i32) {
    %c0_i32 = arith.constant 0 : i32
    %c0_i32_0 = arith.constant 0 : i32
    return %arg0, %c0_i32 : i32, i32
  }
}

</mosaic_0001>

<bundles_post_ra>
// kernel: tpu_custom_call.1
= control target key start
LH: loop header
LB: loop body
LE: loop exit
PB: predicated region body
PF: predicated region fallthrough
CT: control target
= control target key end

     0   :  { %8 = vsyncpa [#allocation3], 0  ;;  %s191_s0 = inlined_call_operand.hbm [shape: f32[2,128], index: 0, kind: input, shape index: {}]   ;;  %s192_s1 = inlined_call_operand.hbm [shape: f32[1,128], index: 1, kind: input, shape index: {}]   ;;  %s193_s2 = inlined_call_operand.vmem [shape: f32[1,128], index: 2, kind: input, shape index: {}]   ;;  %s194_s3 = inlined_call_operand.hbm [shape: f32[2,128], index: 3, kind: output, shape index: {}]  }
   0x1   :  { %9 = vsyncpa [#allocation6], 0 }
   0x2   :  { %10 = vsyncpa [#allocation4], 0  ;;  %s16_s14 = sshll.u32 %s191_s0, 4  ;;  %s156_s15 = smov [#allocation2]   ;;  %s17_s14 = int_to_ptr.hbm [resolvable:$true] %s16_s14 }
   0x3   :  { %s18_s16 = sshll.u32 %s156_s15, 4  ;;  %s27_s19 = sshll.u32 %s192_s1, 4  ;;  %s19_s16 = int_to_ptr.vmem [resolvable:$true] %s18_s16  ;;  %s28_s19 = int_to_ptr.hbm [resolvable:$true] %s27_s19 }
   0x4   :  { %21 = dma.hbm_to_vmem [thread:$0]  %s17_s14, 32, %s19_s16, [#allocation3]  }
   0x5   :  { %s157_s20 = smov [#allocation5]  }
   0x6   :  { %s29_s21 = sshll.u32 %s157_s20, 4  ;;  %s30_s21 = int_to_ptr.vmem [resolvable:$true] %s29_s21 }
   0x7   :  { %32 = dma.hbm_to_vmem [thread:$0]  %s28_s19, 16, %s30_s21, [#allocation6]  }
   0x8   :  { %150 = dma.done.wait [#allocation3], 32  }
   0x9   :  { %151 = vsyncadd [#allocation3], 4294967264 }
   0xa   :  { %152 = dma.done.wait [#allocation6], 16  }
   0xb   :  { %153 = vsyncadd [#allocation6], 4294967280  ;;  %v43_v0 = vld [vmem:[#allocation2] sm:$0x3]  ;;  %v76_v1 = vld [vmem:[#allocation5] ss:$0 sm:$0xff] }
   0xc   :  { %v77_v2 = vld [vmem:[%s193_s2] ss:$0 sm:$0xff]  ;;  %s158_s23 = smov [#allocation7]   ;;  %s62_s26 = sshll.u32 %s194_s3, 4  ;;  %v48_v3 = vmul.f32 %v76_v1, %v43_v0  ;;  %s63_s26 = int_to_ptr.hbm [resolvable:$true] %s62_s26 }
   0xd   :  { %s60_s24 = sshll.u32 %s158_s23, 4  ;;  %s61_s24 = int_to_ptr.vmem [resolvable:$true] %s60_s24 }
   0xe   :  { %v53_v4 = vadd.f32 %v77_v2, %v48_v3 }
  0x10   :  { %54 = vst [vmem:[#allocation7] sm:$0x3] %v53_v4 }
  0x11   :  { %65 = dma.vmem_to_hbm [thread:$0]  %s61_s24, 32, %s63_s26, [#allocation4]  }
  0x12   :  { %154 = dma.done.wait [#allocation4], 32  }
  0x13   :  { %155 = vsyncadd [#allocation4], 4294967264 }
  0x14   :  { %70 = vsyncpa [#allocation3], 1 }
  0x15   :  { %71 = vsyncpa [#allocation6], 1 }
  0x16   :  { %72 = vsyncpa [#allocation4], 1 }

</bundles_post_ra>
